<compile_context>
chip_gen: v6e
topology: v6e:2x2x1
jax: 0.10.0
libtpu: 0.0.40
codegen_flags: <defaults>
</compile_context>

<pallas_src>
import jax
import jax.numpy as jnp
from jax.experimental import pallas as pl
from jax.experimental.pallas import tpu as pltpu


def _round_up(x, m):
    return (x + m - 1) // m * m


def _mlp_kernel(x_ref, w1_ref, b1_ref, w2_ref, b2_ref, w3_ref, b3_ref, o_ref):
    # In-kernel cast of the streamed input (f32 in HBM -> MXU dtype in vregs).
    x = x_ref[...].astype(w1_ref.dtype)
    # Layer 1: Linear(n_input, 2*n_hidden) + ReLU (f32 accumulate on the MXU)
    h1 = jnp.dot(x, w1_ref[...], preferred_element_type=jnp.float32)
    h1 = jnp.maximum(h1 + b1_ref[...], 0.0)
    # Layer 2: Linear(2*n_hidden, n_hidden) + ReLU
    h2 = jnp.dot(h1.astype(w2_ref.dtype), w2_ref[...],
                 preferred_element_type=jnp.float32)
    h2 = jnp.maximum(h2 + b2_ref[...], 0.0)
    # Layer 3: Linear(n_hidden, n_output) + sigmoid on the real columns only.
    h3 = jnp.dot(h2.astype(w3_ref.dtype), w3_ref[...],
                 preferred_element_type=jnp.float32)
    o_ref[...] = jax.nn.sigmoid(h3 + b3_ref[...]).astype(o_ref.dtype)


def simulator_forward(x, params, *, batch_tile=512, use_bf16=True):
    """Pallas implementation of Simulator.forward.

    x: (B, n_input) float32
    params: dict with w1 (n_in, 2h), b1 (1, 2h), w2 (2h, h), b2 (1, h),
            w3 (h, n_out), b3 (1, n_out)
    returns: (B, n_output) float32
    """
    B, n_in = x.shape
    w1, b1 = params["w1"], params["b1"]
    w2, b2 = params["w2"], params["b2"]
    w3, b3 = params["w3"], params["b3"]
    n_h2 = w1.shape[1]
    n_h = w2.shape[1]
    n_out = w3.shape[1]

    # --- dtypes: bf16 for MXU operands (weights cast once here; x cast inside
    # the kernel), f32 for biases / activation math.
    compute_dtype = jnp.bfloat16 if use_bf16 else jnp.float32
    w1c = w1.astype(compute_dtype)
    w2c = w2.astype(compute_dtype)
    w3c = w3.astype(compute_dtype)
    b1c = b1.astype(jnp.float32)
    b2c = b2.astype(jnp.float32)
    b3c = b3.astype(jnp.float32)

    # --- Batch tiling: bf16 vregs pack 16 sublanes, so align the row tile to 16
    # (8 for f32). Cap the tile so the grid has >= ~4 steps (2-TC sharding on
    # v7x + DMA/compute overlap), but never exceed batch_tile.
    row_align = 16 if use_bf16 else 8
    bt = min(int(batch_tile), _round_up(pl.cdiv(B, 4), row_align))
    bt = _round_up(max(bt, row_align), row_align)
    grid = (pl.cdiv(B, bt),)  # ragged last block is masked by Pallas

    itemsize = lambda a: jnp.dtype(a.dtype).itemsize
    flops = 2 * B * (n_in * n_h2 + n_h2 * n_h + n_h * n_out)
    bytes_accessed = (
        B * n_in * itemsize(x)
        + sum(a.size * itemsize(a) for a in (w1c, w2c, w3c, b1c, b2c, b3c))
        + B * n_out * 4
    )
    cost = pl.CostEstimate(
        flops=flops,
        transcendentals=B * n_out,  # sigmoid on real columns only
        bytes_accessed=bytes_accessed,
    )

    out = pl.pallas_call(
        _mlp_kernel,
        out_shape=jax.ShapeDtypeStruct((B, n_out), jnp.float32),
        grid_spec=pltpu.PrefetchScalarGridSpec(
            num_scalar_prefetch=0,
            grid=grid,
            in_specs=[
                pl.BlockSpec((bt, n_in), lambda i: (i, 0)),      # streamed input
                pl.BlockSpec((n_in, n_h2), lambda i: (0, 0)),    # resident weights
                pl.BlockSpec((1, n_h2), lambda i: (0, 0)),
                pl.BlockSpec((n_h2, n_h), lambda i: (0, 0)),
                pl.BlockSpec((1, n_h), lambda i: (0, 0)),
                pl.BlockSpec((n_h, n_out), lambda i: (0, 0)),
                pl.BlockSpec((1, n_out), lambda i: (0, 0)),
            ],
            out_specs=pl.BlockSpec((bt, n_out), lambda i: (i, 0)),
        ),
        compiler_params=pltpu.CompilerParams(
            dimension_semantics=("parallel",),  # shards batch across v7x's 2 TCs
        ),
        cost_estimate=cost,
    )(x, w1c, b1c, w2c, b2c, w3c, b3c)

    return out


def init_params(key, n_input, n_hidden, n_output):
    """Deterministic init mirroring nn.Linear default (uniform +/- 1/sqrt(fan_in))."""
    ks = jax.random.split(key, 6)

    def linear(kw, kb, fan_in, fan_out):
        bound = 1.0 / jnp.sqrt(fan_in)
        w = jax.random.uniform(kw, (fan_in, fan_out), jnp.float32, -bound, bound)
        b = jax.random.uniform(kb, (1, fan_out), jnp.float32, -bound, bound)
        return w, b

    w1, b1 = linear(ks[0], ks[1], n_input, 2 * n_hidden)
    w2, b2 = linear(ks[2], ks[3], 2 * n_hidden, n_hidden)
    w3, b3 = linear(ks[4], ks[5], n_hidden, n_output)
    return {"w1": w1, "b1": b1, "w2": w2, "b2": b2, "w3": w3, "b3": b3}


def reference_forward(x, p):
    h = jnp.maximum(x @ p["w1"] + p["b1"], 0.0)
    h = jnp.maximum(h @ p["w2"] + p["b2"], 0.0)
    return jax.nn.sigmoid(h @ p["w3"] + p["b3"])


if __name__ == "__main__":
    n_input, n_hidden, n_output = 32, 32, 16
    batch = 300  # deliberately not a multiple of the tile to exercise the masked last block

    key = jax.random.PRNGKey(0)
    kx, kp = jax.random.split(key)
    x = jax.random.normal(kx, (batch, n_input), jnp.float32)
    params = init_params(kp, n_input, n_hidden, n_output)
    ref = reference_forward(x, params)

    # 1) Pure-f32 path: tight match against the reference.
    out_f32 = simulator_forward(x, params, use_bf16=False)
    out_f32 = jax.block_until_ready(out_f32)
    assert out_f32.shape == (batch, n_output)
    assert jnp.allclose(out_f32, ref, atol=1e-5, rtol=1e-5), "f32 mismatch vs reference"

    # 2) bf16-MXU path (default fast config): looser tolerance for the cast.
    out_bf16 = simulator_forward(x, params, use_bf16=True)
    out_bf16 = jax.block_until_ready(out_bf16)
    assert out_bf16.shape == (batch, n_output)
    assert jnp.allclose(out_bf16, ref, atol=3e-2, rtol=3e-2), "bf16 mismatch vs reference"

    print("KERNEL_OK")
</pallas_src>

<mosaic_0001>
module attributes {stable_mosaic.version = 11 : i64} {
  func.func @_mlp_kernel(%arg0: i32, %arg1: memref<80x32xf32, #tpu.memory_space<vmem>>, %arg2: memref<32x64xf32, #tpu.memory_space<vmem>>, %arg3: memref<1x64xf32, #tpu.memory_space<vmem>>, %arg4: memref<64x32xf32, #tpu.memory_space<vmem>>, %arg5: memref<1x32xf32, #tpu.memory_space<vmem>>, %arg6: memref<32x16xf32, #tpu.memory_space<vmem>>, %arg7: memref<1x16xf32, #tpu.memory_space<vmem>>, %arg8: memref<80x16xf32, #tpu.memory_space<vmem>>) attributes {dimension_semantics = [#tpu.dimension_semantics<parallel>], iteration_bounds = array<i64: 4>, scalar_prefetch = 0 : i64, scratch_operands = 0 : i64, tpu.core_type = #tpu.core_type<tc>, window_params = [{transform_indices = @transform_0, window_bounds = array<i64: 80, 32>}, {pipeline_mode = #tpu.pipeline_mode<synchronous>, transform_indices = @transform_1, window_bounds = array<i64: 32, 64>}, {pipeline_mode = #tpu.pipeline_mode<synchronous>, transform_indices = @transform_2, window_bounds = array<i64: 1, 64>}, {pipeline_mode = #tpu.pipeline_mode<synchronous>, transform_indices = @transform_3, window_bounds = array<i64: 64, 32>}, {pipeline_mode = #tpu.pipeline_mode<synchronous>, transform_indices = @transform_4, window_bounds = array<i64: 1, 32>}, {pipeline_mode = #tpu.pipeline_mode<synchronous>, transform_indices = @transform_5, window_bounds = array<i64: 32, 16>}, {pipeline_mode = #tpu.pipeline_mode<synchronous>, transform_indices = @transform_6, window_bounds = array<i64: 1, 16>}, {transform_indices = @transform_7, window_bounds = array<i64: 80, 16>}]} {
    %c0 = arith.constant 0 : index
    %c0_0 = arith.constant 0 : index
    %0 = vector.load %arg1[%c0, %c0_0] : memref<80x32xf32, #tpu.memory_space<vmem>>, vector<80x32xf32>
    %c0_1 = arith.constant 0 : index
    %c0_2 = arith.constant 0 : index
    %1 = vector.load %arg2[%c0_1, %c0_2] : memref<32x64xf32, #tpu.memory_space<vmem>>, vector<32x64xf32>
    %cst = arith.constant dense<0.000000e+00> : vector<80x64xf32>
    %2 = tpu.matmul %0, %1, %cst {dimension_numbers = #tpu.dot_dimension_numbers<[1], [0], [0], [1], [0, 0, 1, 1], [], []>} : vector<80x32xf32>, vector<32x64xf32>, vector<80x64xf32> -> vector<80x64xf32>
    %c0_3 = arith.constant 0 : index
    %c0_4 = arith.constant 0 : index
    %3 = vector.load %arg3[%c0_3, %c0_4] : memref<1x64xf32, #tpu.memory_space<vmem>>, vector<1x64xf32>
    %4 = vector.broadcast %3 : vector<1x64xf32> to vector<80x64xf32>
    %5 = arith.addf %2, %4 : vector<80x64xf32>
    %cst_5 = arith.constant 0.000000e+00 : f32
    %6 = vector.broadcast %cst_5 : f32 to vector<80x64xf32>
    %7 = arith.maximumf %5, %6 : vector<80x64xf32>
    %c0_6 = arith.constant 0 : index
    %c0_7 = arith.constant 0 : index
    %8 = vector.load %arg4[%c0_6, %c0_7] : memref<64x32xf32, #tpu.memory_space<vmem>>, vector<64x32xf32>
    %cst_8 = arith.constant dense<0.000000e+00> : vector<80x32xf32>
    %9 = tpu.matmul %7, %8, %cst_8 {dimension_numbers = #tpu.dot_dimension_numbers<[1], [0], [0], [1], [0, 0, 1, 1], [], []>} : vector<80x64xf32>, vector<64x32xf32>, vector<80x32xf32> -> vector<80x32xf32>
    %c0_9 = arith.constant 0 : index
    %c0_10 = arith.constant 0 : index
    %10 = vector.load %arg5[%c0_9, %c0_10] : memref<1x32xf32, #tpu.memory_space<vmem>>, vector<1x32xf32>
    %11 = vector.broadcast %10 : vector<1x32xf32> to vector<80x32xf32>
    %12 = arith.addf %9, %11 : vector<80x32xf32>
    %cst_11 = arith.constant 0.000000e+00 : f32
    %13 = vector.broadcast %cst_11 : f32 to vector<80x32xf32>
    %14 = arith.maximumf %12, %13 : vector<80x32xf32>
    %c0_12 = arith.constant 0 : index
    %c0_13 = arith.constant 0 : index
    %15 = vector.load %arg6[%c0_12, %c0_13] : memref<32x16xf32, #tpu.memory_space<vmem>>, vector<32x16xf32>
    %cst_14 = arith.constant dense<0.000000e+00> : vector<80x16xf32>
    %16 = tpu.matmul %14, %15, %cst_14 {dimension_numbers = #tpu.dot_dimension_numbers<[1], [0], [0], [1], [0, 0, 1, 1], [], []>} : vector<80x32xf32>, vector<32x16xf32>, vector<80x16xf32> -> vector<80x16xf32>
    %c0_15 = arith.constant 0 : index
    %c0_16 = arith.constant 0 : index
    %17 = vector.load %arg7[%c0_15, %c0_16] : memref<1x16xf32, #tpu.memory_space<vmem>>, vector<1x16xf32>
    %18 = vector.broadcast %17 : vector<1x16xf32> to vector<80x16xf32>
    %19 = arith.addf %16, %18 : vector<80x16xf32>
    %20 = arith.negf %19 : vector<80x16xf32>
    %21 = math.exp %20 : vector<80x16xf32>
    %cst_17 = arith.constant 1.000000e+00 : f32
    %22 = vector.broadcast %cst_17 : f32 to vector<80x16xf32>
    %23 = arith.addf %22, %21 : vector<80x16xf32>
    %24 = arith.divf %22, %23 : vector<80x16xf32>
    %c0_18 = arith.constant 0 : index
    %c0_19 = arith.constant 0 : index
    %25 = vector.load %arg8[%c0_18, %c0_19] : memref<80x16xf32, #tpu.memory_space<vmem>>, vector<80x16xf32>
    tpu.vector_store %arg8[%c0_18, %c0_19], %24 {strides = array<i32>} : memref<80x16xf32, #tpu.memory_space<vmem>>, vector<80x16xf32>,
    return
  }
  func.func @transform_0(%arg0: i32) -> (i32, i32) {
    %c0_i32 = arith.constant 0 : i32
    %c0_i32_0 = arith.constant 0 : i32
    return %arg0, %c0_i32 : i32, i32
  }
  func.func @transform_1(%arg0: i32) -> (i32, i32) {
    %c0_i32 = arith.constant 0 : i32
    %c0_i32_0 = arith.constant 0 : i32
    %c0_i32_1 = arith.constant 0 : i32
    return %c0_i32, %c0_i32_0 : i32, i32
  }
  func.func @transform_2(%arg0: i32) -> (i32, i32) {
    %c0_i32 = arith.constant 0 : i32
    %c0_i32_0 = arith.constant 0 : i32
    %c0_i32_1 = arith.constant 0 : i32
    return %c0_i32, %c0_i32_0 : i32, i32
  }
  func.func @transform_3(%arg0: i32) -> (i32, i32) {
    %c0_i32 = arith.constant 0 : i32
    %c0_i32_0 = arith.constant 0 : i32
    %c0_i32_1 = arith.constant 0 : i32
    return %c0_i32, %c0_i32_0 : i32, i32
  }
  func.func @transform_4(%arg0: i32) -> (i32, i32) {
    %c0_i32 = arith.constant 0 : i32
    %c0_i32_0 = arith.constant 0 : i32
    %c0_i32_1 = arith.constant 0 : i32
    return %c0_i32, %c0_i32_0 : i32, i32
  }
  func.func @transform_5(%arg0: i32) -> (i32, i32) {
    %c0_i32 = arith.constant 0 : i32
    %c0_i32_0 = arith.constant 0 : i32
    %c0_i32_1 = arith.constant 0 : i32
    return %c0_i32, %c0_i32_0 : i32, i32
  }
  func.func @transform_6(%arg0: i32) -> (i32, i32) {
    %c0_i32 = arith.constant 0 : i32
    %c0_i32_0 = arith.constant 0 : i32
    %c0_i32_1 = arith.constant 0 : i32
    return %c0_i32, %c0_i32_0 : i32, i32
  }
  func.func @transform_7(%arg0: i32) -> (i32, i32) {
    %c0_i32 = arith.constant 0 : i32
    %c0_i32_0 = arith.constant 0 : i32
    return %arg0, %c0_i32 : i32, i32
  }
}

</mosaic_0001>

<bundles_post_ra>
// kernel: tpu_custom_call.1
= control target key start
LH: loop header
LB: loop body
LE: loop exit
PB: predicated region body
PF: predicated region fallthrough
CT: control target
= control target key end

     0   :  { %s1583_s24 = smov 0   ;;  %s1585_s25 = smov 0   ;;  %s1789_s0 = inlined_call_operand.vmem [shape: f32[300,32], index: 0, kind: input, shape index: {}]   ;;  %s1790_s1 = inlined_call_operand.vmem [shape: f32[32,64], index: 1, kind: input, shape index: {}]   ;;  %s1791_s2 = inlined_call_operand.vmem [shape: f32[1,64], index: 2, kind: input, shape index: {}]   ;;  %s1792_s3 = inlined_call_operand.vmem [shape: f32[64,32], index: 3, kind: input, shape index: {}]   ;;  %s1793_s4 = inlined_call_operand.vmem [shape: f32[1,32], index: 4, kind: input, shape index: {}]   ;;  %s1794_s5 = inlined_call_operand.vmem [shape: f32[32,16], index: 5, kind: input, shape index: {}]   ;;  %s1795_s6 = inlined_call_operand.vmem [shape: f32[1,16], index: 6, kind: input, shape index: {}]   ;;  %s1796_s7 = inlined_call_operand.vmem [shape: f32[300,16], index: 7, kind: output, shape index: {}]  }
   0x1   :  { %s1587_s26 = smov 0  }
   0x2 LB: > { %s1596_s27 = sadd.s32 4294967295, %s1509_s26   ;;  %s1598_s28 = sadd.s32 1, %s1509_s26   ;;  %s1509_s26 = sphi %s1587_s26, %s1803_s26   ;;  %s1505_s25 = sphi %s1585_s25, %s1802_s25   ;;  %s1501_s24 = sphi %s1583_s24, %s1801_s24  }
   0x3   : > { %s173_s29 = ssub.s32 %s1509_s26, %s1598_s28  ;;  %s176_s30 = sadd.s32 1, %s1505_s25 }
   0x4   : > { %p174_p0 = scmp.eq.s32.totalorder %s173_s29, 0  ;;  %p186_p1 = scmp.ne.s32.totalorder %s1505_s25, %s1501_s24 }
   0x5   : > { %p187_p2 = scmp.eq.s32.totalorder %s1596_s27, 3  ;;  %p1132_p3 = scmp.ge.s32.totalorder %s1509_s26, 1 }
   0x6   : > { %s1606_s8 = scalar_select %p174_p0, %s1505_s25, %s176_s30  }
   0x7   : > { %p1608_p4 = por %p187_p2, %p186_p1  ;;  %p246_p5 = scmp.lt.s32.totalorder %s1509_s26, 5 }
   0x9   : > { %p247_p6 = pnand %p1132_p3, %p246_p5 }
   0xa   : > { %s1619_s14 = smul.u32 (!%p247_p6), 10, %s1596_s27  ;;  %s278_s22 = sand.u32 (!%p247_p6), 1, %s1501_s24  }
   0xb   : > { %250 = sbr.rel (%p247_p6) target bundleno = 726 (0x2d6), region = 48 }
   0xc   : > { %p286_p7 = scmp.lt.s32.totalorder (!%p247_p6), %s1619_s14, 37  ;;  %s1321_s23 = smul.u32 (!%p247_p6), 80, %s278_s22 }
   0xe   : > { %s1708_s26 = scalar_lea.vmem (!%p247_p6), [#allocation2], %s1321_s23  }
  0x10   : > { %v313_v0 = vld [vmem:[%s1790_s1 + $0x18] sm:$0xff]  ;;  %v312_v1 = vld [vmem:[%s1790_s1 + $0x10] sm:$0xff]  ;;  %v311_v2 = vld [vmem:[%s1790_s1 + $0x8] sm:$0xff]  ;;  %s287_s19 = scalar_select %p286_p7, %s1619_s14, 37  ;;  %vm321_vm0 = vcmask 261120   ;;  %vm492_vm1 = vcmask 523264  }
  0x11   : > { %1236 = vmatprep.subr.mxu0 %v313_v0  ;;  %1313 = vmatprep.subr.mxu1 %v313_v0  ;;  %v310_v3 = vld [vmem:[%s1790_s1] sm:$0xff]  ;;  %v484_v4 = vld [vmem:[%s1792_s3 + $0x38] sm:$0xff]  ;;  %v483_v11 = vld [vmem:[%s1792_s3 + $0x30] sm:$0xff]  ;;  %vm864_vm2 = vcmask 130048   ;;  %s883_s24 = ssub.s32 (%p1608_p4), 38, %s1619_s14 }
  0x12   : > { %1237 = vmatpush3.msra.mxu0 %v313_v0  ;;  %1317 = vmatpush3.msra.mxu1 %v313_v0  ;;  %s1133_s20 = sshll.u32 %s287_s19, 3  ;;  %v482_v14 = vld [vmem:[%s1792_s3 + $0x28] sm:$0xff]  ;;  %v481_v16 = vld [vmem:[%s1792_s3 + $0x20] sm:$0xff]  ;;  %v480_v18 = vld [vmem:[%s1792_s3 + $0x18] sm:$0xff]  ;;  %p884_p8 = scmp.lt.s32.totalorder (%p1608_p4), %s883_s24, 10 }
  0x13   : > { %1238 = vmatprep.subr.mxu0 %v312_v1  ;;  %1314 = vmatprep.subr.mxu1 %v312_v1  ;;  %s289_s29 = scalar_lea.vmem %s1789_s0, %s1133_s20  ;;  %v479_v19 = vld [vmem:[%s1792_s3 + $0x10] sm:$0xff]  ;;  %v478_v20 = vld [vmem:[%s1792_s3 + $0x8] sm:$0xff]  ;;  %v477_v21 = vld [vmem:[%s1792_s3] sm:$0xff] }
  0x14   : > { %1239 = vmatpush3.msra.mxu0 %v312_v1  ;;  %1318 = vmatpush3.msra.mxu1 %v312_v1  ;;  %v300_v5 = vld [vmem:[%s289_s29] sm:$0xff]  ;;  %v301_v6 = vld [vmem:[%s289_s29 + $0x8] sm:$0xff]  ;;  %v302_v7 = vld [vmem:[%s289_s29 + $0x10] sm:$0xff] }
  0x15   : > { %1240 = vmatprep.subr.mxu0 %v311_v2  ;;  %1315 = vmatprep.subr.mxu1 %v311_v2  ;;  %v304_v8 = vld [vmem:[%s289_s29 + $0x20] sm:$0xff]  ;;  %v305_v9 = vld [vmem:[%s289_s29 + $0x28] sm:$0xff]  ;;  %v306_v10 = vld [vmem:[%s289_s29 + $0x30] sm:$0xff] }
  0x16   : > { %1241 = vmatpush3.msra.mxu0 %v311_v2  ;;  %1319 = vmatpush3.msra.mxu1 %v311_v2  ;;  %v303_v12 = vld [vmem:[%s289_s29 + $0x18] sm:$0xff]  ;;  %v308_v15 = vld [vmem:[%s289_s29 + $0x40] sm:$0xff]  ;;  %v309_v17 = vld [vmem:[%s289_s29 + $0x48] sm:$0xff] }
  0x17   : > { %1242 = vmatprep.subr.mxu0 %v310_v3  ;;  %1316 = vmatprep.subr.mxu1 %v310_v3  ;;  %v307_v13 = vld [vmem:[%s289_s29 + $0x38] sm:$0xff]  ;;  %v1134_v23 = vld [vmem:[%s1791_s2] ss:$0 sm:$0xff]  ;;  %v650_v54 = vld [vmem:[%s1794_s5 + $0x10] sm:$0xff]  ;;  %s1189_s29 = smul.u32 (%p1608_p4), 80, %s1596_s27 }
  0x18   : > { %1243 = vmatpush3.msra.mxu0 %v310_v3  ;;  %1320 = vmatpush3.msra.mxu1 %v310_v3  ;;  %v651_v22 = vld [vmem:[%s1794_s5 + $0x18] sm:$0xff]  ;;  %v649_v55 = vld [vmem:[%s1794_s5 + $0x8] sm:$0xff]  ;;  %v648_v56 = vld [vmem:[%s1794_s5] sm:$0xff] }
  0x19   : > { %1244 = vmatprep.mubr.msk.f32.mxu0 %vm321_vm0, %v300_v5  ;;  %1259 = vmatprep.subr.mxu1 %v484_v4  ;;  %v1145_v57 = vld [vmem:[%s1793_s4] ss:$0 sm:$0xff]  ;;  %s1737_s11 = scalar_lea.vmem (%p1608_p4), %s1796_s7, %s1189_s29  }
  0x1a   : > { %1245 = vmatmul.mubr.msk.f32.vlgmr.msra.gmra.mxu0 %vm321_vm0, %v301_v6  ;;  %1250 = vmatprep.mubr.msk.f32.mxu1 %vm321_vm0, %v304_v8 }
  0x1b   : > { %1247 = vmatprep.mubr.msk.f32.mxu0 %vm321_vm0, %v302_v7  ;;  %1251 = vmatmul.mubr.msk.f32.vlgmr.msra.gmra.mxu1 %vm321_vm0, %v305_v9 }
  0x1c   : > { %1253 = vmatprep.mubr.msk.f32.mxu1 %vm321_vm0, %v306_v10  ;;  %1260 = vmatpush3.msra.mxu1 %v484_v4 }
  0x1d   : > { %1261 = vmatprep.subr.mxu1 %v483_v11  ;;  %1290 = vmatprep.subr.mxu0 %v651_v22 }
  0x1e   : > { %1248 = vmatmul.mubr.msk.f32.gmra.mxu0 %vm321_vm0, %v303_v12  ;;  %1262 = vmatpush3.msra.mxu1 %v483_v11 }
  0x1f   : > { %1254 = vmatmul.mubr.msk.f32.gmra.mxu1 %vm321_vm0, %v307_v13  ;;  %1263 = vmatprep.subr.mxu1 %v482_v14 }
  0x20   : > { %1256 = vmatprep.mubr.msk.f32.mxu1 %vm321_vm0, %v308_v15  ;;  %1264 = vmatpush3.msra.mxu1 %v482_v14 }
  0x21   : > { %1265 = vmatprep.subr.mxu1 %v481_v16  ;;  %1291 = vmatpush3.msra.mxu0 %v651_v22 }
  0x22   : > { %1266 = vmatpush3.msra.mxu1 %v481_v16  ;;  %1292 = vmatprep.subr.mxu0 %v650_v54 }
  0x23   : > { %1257 = vmatmul.mubr.msk.f32.gmra.mxu1 %vm321_vm0, %v309_v17  ;;  %1267 = vmatprep.subr.mxu1 %v480_v18 }
  0x24   : > { %1268 = vmatpush3.msra.mxu1 %v480_v18  ;;  %1293 = vmatpush3.msra.mxu0 %v650_v54 }
  0x25   : > { %1269 = vmatprep.subr.mxu1 %v479_v19  ;;  %1294 = vmatprep.subr.mxu0 %v649_v55 }
  0x26   : > { %1270 = vmatpush3.msra.mxu1 %v479_v19  ;;  %1295 = vmatpush3.msra.mxu0 %v649_v55 }
  0x27   : > { %1271 = vmatprep.subr.mxu1 %v478_v20  ;;  %1296 = vmatprep.subr.mxu0 %v648_v56 }
  0x28   : > { %1272 = vmatpush3.msra.mxu1 %v478_v20  ;;  %1297 = vmatpush3.msra.mxu0 %v648_v56 }
  0x29   : > { %1273 = vmatprep.subr.mxu1 %v477_v21 }
  0x2a   : > { %1274 = vmatpush3.msra.mxu1 %v477_v21 }
  0xda   : > { %v1246_v24 = vpop.f32.mrf.mxu0 }
  0xdb   : > { %v1252_v25 = vpop.f32.mrf.mxu1  ;;  %v424_v26 = vadd.f32 %v1246_v24, %v1134_v23  ;;  %v1156_v24 = vld [vmem:[%s1795_s6] ss:$0 sm:$0xff] }
  0xdc   : > { %v418_v27 = vpop.f32.mrf.mxu0  ;;  %v444_v44 = vadd.f32 %v1252_v25, %v1134_v23 }
  0xdd   : > { %v419_v28 = vadd.f32 %v1134_v23, %v418_v27  ;;  %v438_v29 = vpop.f32.mrf.mxu1  ;;  %v468_v34 = vmax.f32 %v424_v26, 0.0 }
  0xde   : > { %v1249_v30 = vpop.f32.mrf.mxu0  ;;  %v439_v32 = vadd.f32 %v1134_v23, %v438_v29  ;;  %v472_v48 = vmax.f32 %v444_v44, 0.0 }
  0xdf   : > { %v467_v31 = vmax.f32 %v419_v28, 0.0  ;;  %v1255_v33 = vpop.f32.mrf.mxu1  ;;  %v434_v35 = vadd.f32 %v1249_v30, %v1134_v23 }
  0xe0   : > { %v428_v36 = vpop.f32.mrf.mxu0  ;;  %v471_v40 = vmax.f32 %v439_v32, 0.0  ;;  %v454_v49 = vadd.f32 %v1255_v33, %v1134_v23 }
  0xe1   : > { %v429_v37 = vadd.f32 %v1134_v23, %v428_v36  ;;  %1275 = vmatprep.mubr.msk.f32.mxu1 %vm492_vm1, %v467_v31  ;;  %v448_v38 = vpop.f32.mrf.mxu1  ;;  %v470_v43 = vmax.f32 %v434_v35, 0.0 }
  0xe2   : > { %1276 = vmatmul.mubr.msk.f32.vlgmr.msra.gmra.mxu1 %vm492_vm1, %v468_v34  ;;  %v449_v41 = vadd.f32 %v1134_v23, %v448_v38  ;;  %v474_v51 = vmax.f32 %v454_v49, 0.0 }
  0xe3   : > { %v469_v39 = vmax.f32 %v429_v37, 0.0  ;;  %v1258_v42 = vpop.f32.mrf.mxu1 }
  0xe4   : > { %v473_v46 = vmax.f32 %v449_v41, 0.0  ;;  %v464_v52 = vadd.f32 %v1258_v42, %v1134_v23 }
  0xe5   : > { %1278 = vmatprep.mubr.msk.f32.mxu1 %vm492_vm1, %v469_v39  ;;  %v458_v45 = vpop.f32.mrf.mxu1 }
  0xe6   : > { %1279 = vmatmul.mubr.msk.f32.gmra.mxu1 %vm492_vm1, %v470_v43  ;;  %v459_v47 = vadd.f32 %v1134_v23, %v458_v45  ;;  %v476_v53 = vmax.f32 %v464_v52, 0.0 }
  0xe7   : > { %1281 = vmatprep.mubr.msk.f32.mxu1 %vm492_vm1, %v471_v40 }
  0xe8   : > { %v475_v50 = vmax.f32 %v459_v47, 0.0 }
  0xea   : > { %1282 = vmatmul.mubr.msk.f32.gmra.mxu1 %vm492_vm1, %v472_v48 }
  0xeb   : > { %1284 = vmatprep.mubr.msk.f32.mxu1 %vm492_vm1, %v473_v46 }
  0xee   : > { %1285 = vmatmul.mubr.msk.f32.gmra.mxu1 %vm492_vm1, %v474_v51 }
  0xef   : > { %1287 = vmatprep.mubr.msk.f32.mxu1 %vm492_vm1, %v475_v50 }
  0xf2   : > { %1288 = vmatmul.mubr.msk.f32.gmra.mxu1 %vm492_vm1, %v476_v53 }
 0x1a2   : > { %v1277_v58 = vpop.f32.mrf.mxu1 }
 0x1a3   : > { %v595_v59 = vadd.f32 %v1277_v58, %v1145_v57 }
 0x1a4   : > { %v589_v60 = vpop.f32.mrf.mxu1 }
 0x1a5   : > { %v590_v61 = vadd.f32 %v1145_v57, %v589_v60  ;;  %v639_v0 = vmax.f32 %v595_v59, 0.0 }
 0x1a6   : > { %v1280_v62 = vpop.f32.mrf.mxu1 }
 0x1a7   : > { %v638_v63 = vmax.f32 %v590_v61, 0.0  ;;  %v605_v1 = vadd.f32 %v1280_v62, %v1145_v57 }
 0x1a8   : > { %v599_v2 = vpop.f32.mrf.mxu1 }
 0x1a9   : > { %v600_v3 = vadd.f32 %v1145_v57, %v599_v2  ;;  %1298 = vmatprep.mubr.msk.f32.mxu0 %vm321_vm0, %v638_v63  ;;  %v641_v6 = vmax.f32 %v605_v1, 0.0 }
 0x1aa   : > { %v1283_v4 = vpop.f32.mrf.mxu1  ;;  %1299 = vmatmul.mubr.msk.f32.vlgmr.msra.gmra.mxu0 %vm321_vm0, %v639_v0 }
 0x1ab   : > { %v640_v5 = vmax.f32 %v600_v3, 0.0  ;;  %v615_v7 = vadd.f32 %v1283_v4, %v1145_v57 }
 0x1ac   : > { %v609_v8 = vpop.f32.mrf.mxu1 }
 0x1ad   : > { %v610_v9 = vadd.f32 %v1145_v57, %v609_v8  ;;  %1301 = vmatprep.mubr.msk.f32.mxu0 %vm321_vm0, %v640_v5  ;;  %v643_v12 = vmax.f32 %v615_v7, 0.0 }
 0x1ae   : > { %v1286_v10 = vpop.f32.mrf.mxu1  ;;  %1302 = vmatmul.mubr.msk.f32.gmra.mxu0 %vm321_vm0, %v641_v6 }
 0x1af   : > { %v642_v11 = vmax.f32 %v610_v9, 0.0  ;;  %v625_v13 = vadd.f32 %v1286_v10, %v1145_v57 }
 0x1b0   : > { %v619_v14 = vpop.f32.mrf.mxu1 }
 0x1b1   : > { %v620_v15 = vadd.f32 %v1145_v57, %v619_v14  ;;  %1304 = vmatprep.mubr.msk.f32.mxu0 %vm321_vm0, %v642_v11  ;;  %v645_v18 = vmax.f32 %v625_v13, 0.0 }
 0x1b2   : > { %v1289_v16 = vpop.f32.mrf.mxu1  ;;  %1305 = vmatmul.mubr.msk.f32.gmra.mxu0 %vm321_vm0, %v643_v12 }
 0x1b3   : > { %v644_v17 = vmax.f32 %v620_v15, 0.0  ;;  %v635_v19 = vadd.f32 %v1289_v16, %v1145_v57 }
 0x1b4   : > { %v629_v20 = vpop.f32.mrf.mxu1 }
 0x1b5   : > { %v630_v21 = vadd.f32 %v1145_v57, %v629_v20  ;;  %1307 = vmatprep.mubr.msk.f32.mxu0 %vm321_vm0, %v644_v17  ;;  %v647_v23 = vmax.f32 %v635_v19, 0.0 }
 0x1b6   : > { %1308 = vmatmul.mubr.msk.f32.gmra.mxu0 %vm321_vm0, %v645_v18 }
 0x1b7   : > { %v646_v22 = vmax.f32 %v630_v21, 0.0 }
 0x1b9   : > { %1310 = vmatprep.mubr.msk.f32.mxu0 %vm321_vm0, %v646_v22 }
 0x1ba   : > { %1311 = vmatmul.mubr.msk.f32.gmra.mxu0 %vm321_vm0, %v647_v23 }
 0x26a   : > { %v1300_v25 = vpop.f32.mrf.mxu0 }
 0x26b   : > { %v761_v26 = vadd.f32 %v1300_v25, %v1156_v24 }
 0x26c   : > { %v755_v27 = vpop.f32.mrf.mxu0 }
 0x26d   : > { %v1168_v28 = vmul.f32 -1.442695, %v761_v26  ;;  %v756_v29 = vadd.f32 %v1156_v24, %v755_v27 }
 0x26e   : > { %v1303_v30 = vpop.f32.mrf.mxu0 }
 0x26f   : > { %1411 = vpow2.f32 %v1168_v28  ;;  %v1167_v31 = vmul.f32 -1.442695, %v756_v29  ;;  %v771_v32 = vadd.f32 %v1303_v30, %v1156_v24 }
 0x270   : > { %v765_v33 = vpop.f32.mrf.mxu0 }
 0x271   : > { %1413 = vpow2.f32 %v1167_v31  ;;  %v1170_v34 = vmul.f32 -1.442695, %v771_v32  ;;  %v766_v35 = vadd.f32 %v1156_v24, %v765_v33 }
 0x272   : > { %v1306_v36 = vpop.f32.mrf.mxu0 }
 0x273   : > { %1415 = vpow2.f32 %v1170_v34  ;;  %v1169_v37 = vmul.f32 -1.442695, %v766_v35  ;;  %v781_v38 = vadd.f32 %v1306_v36, %v1156_v24 }
 0x274   : > { %v775_v39 = vpop.f32.mrf.mxu0 }
 0x275   : > { %1417 = vpow2.f32 %v1169_v37  ;;  %v1172_v40 = vmul.f32 -1.442695, %v781_v38  ;;  %v776_v41 = vadd.f32 %v1156_v24, %v775_v39 }
 0x276   : > { %v1309_v42 = vpop.f32.mrf.mxu0 }
 0x277   : > { %1419 = vpow2.f32 %v1172_v40  ;;  %v1171_v43 = vmul.f32 -1.442695, %v776_v41  ;;  %v791_v44 = vadd.f32 %v1309_v42, %v1156_v24 }
 0x278   : > { %v785_v45 = vpop.f32.mrf.mxu0 }
 0x279   : > { %1421 = vpow2.f32 %v1171_v43  ;;  %v1174_v46 = vmul.f32 -1.442695, %v791_v44  ;;  %v786_v47 = vadd.f32 %v1156_v24, %v785_v45 }
 0x27a   : > { %v1312_v48 = vpop.f32.mrf.mxu0 }
 0x27b   : > { %1423 = vpow2.f32 %v1174_v46  ;;  %v1173_v49 = vmul.f32 -1.442695, %v786_v47  ;;  %v801_v50 = vadd.f32 %v1312_v48, %v1156_v24 }
 0x27c   : > { %v1412_v51 = vpop.eup %1411  ;;  %v795_v52 = vpop.f32.mrf.mxu0 }
 0x27d   : > { %v835_v53 = vadd.f32 1.0, %v1412_v51  ;;  %1425 = vpow2.f32 %v1173_v49  ;;  %v1176_v54 = vmul.f32 -1.442695, %v801_v50  ;;  %v796_v55 = vadd.f32 %v1156_v24, %v795_v52 }
 0x27e   : > { %v1414_v56 = vpop.eup %1413 }
 0x27f   : > { %1427 = vrcp.f32 %v835_v53  ;;  %v834_v57 = vadd.f32 1.0, %v1414_v56  ;;  %v1175_v58 = vmul.f32 -1.442695, %v796_v55 }
 0x280   : > { %v1416_v59 = vpop.eup %1415  ;;  %1429 = vpow2.f32 %v1176_v54 }
 0x281   : > { %1431 = vrcp.f32 %v834_v57  ;;  %v837_v60 = vadd.f32 1.0, %v1416_v59 }
 0x282   : > { %v1418_v61 = vpop.eup %1417  ;;  %1433 = vpow2.f32 %v1175_v58 }
 0x283   : > { %1435 = vrcp.f32 %v837_v60  ;;  %v836_v62 = vadd.f32 1.0, %v1418_v61 }
 0x284   : > { %v1420_v63 = vpop.eup %1419 }
 0x285   : > { %1437 = vrcp.f32 %v836_v62  ;;  %v839_v0 = vadd.f32 1.0, %v1420_v63 }
 0x286   : > { %v1422_v1 = vpop.eup %1421 }
 0x287   : > { %1439 = vrcp.f32 %v839_v0  ;;  %v838_v2 = vadd.f32 1.0, %v1422_v1 }
 0x288   : > { %v1424_v3 = vpop.eup %1423 }
 0x289   : > { %1441 = vrcp.f32 %v838_v2  ;;  %v841_v4 = vadd.f32 1.0, %v1424_v3 }
 0x28a   : > { %v1426_v5 = vpop.eup %1425 }
 0x28b   : > { %1443 = vrcp.f32 %v841_v4  ;;  %v840_v6 = vadd.f32 1.0, %v1426_v5 }
 0x28c   : > { %v1428_v7 = vpop.eup %1427 }
 0x28d   : > { %v1430_v8 = vpop.eup %1429  ;;  %866 = vst.msk [vmem:[%s1708_s26 + $0x8] sm:$0xff] %vm864_vm2, %v1428_v7  ;;  %1445 = vrcp.f32 %v840_v6 }
 0x28e   : > { %v1432_v9 = vpop.eup %1431  ;;  %v843_v10 = vadd.f32 1.0, %v1430_v8 }
 0x28f   : > { %v1434_v11 = vpop.eup %1433  ;;  %865 = vst.msk [vmem:[%s1708_s26] sm:$0xff] %vm864_vm2, %v1432_v9 }
 0x290   : > { %v1436_v12 = vpop.eup %1435  ;;  %1447 = vrcp.f32 %v843_v10  ;;  %v842_v13 = vadd.f32 1.0, %v1434_v11 }
 0x291   : > { %868 = vst.msk [vmem:[%s1708_s26 + $0x18] sm:$0xff] %vm864_vm2, %v1436_v12 }
 0x292   : > { %v1438_v14 = vpop.eup %1437  ;;  %1449 = vrcp.f32 %v842_v13 }
 0x293   : > { %867 = vst.msk [vmem:[%s1708_s26 + $0x10] sm:$0xff] %vm864_vm2, %v1438_v14 }
 0x294   : > { %v1440_v15 = vpop.eup %1439 }
 0x295   : > { %870 = vst.msk [vmem:[%s1708_s26 + $0x28] sm:$0xff] %vm864_vm2, %v1440_v15 }
 0x296   : > { %v1442_v16 = vpop.eup %1441 }
 0x297   : > { %869 = vst.msk [vmem:[%s1708_s26 + $0x20] sm:$0xff] %vm864_vm2, %v1442_v16 }
 0x298   : > { %v1444_v17 = vpop.eup %1443 }
 0x299   : > { %872 = vst.msk [vmem:[%s1708_s26 + $0x38] sm:$0xff] %vm864_vm2, %v1444_v17 }
 0x29a   : > { %v1446_v18 = vpop.eup %1445 }
 0x29b   : > { %871 = vst.msk [vmem:[%s1708_s26 + $0x30] sm:$0xff] %vm864_vm2, %v1446_v18 }
 0x29c   : > { %881 = sbr.rel (!%p1608_p4) target bundleno = 726 (0x2d6), region = 52 }
 0x29d   : > { %v1448_v19 = vpop.eup %1447 }
 0x29e   : > { %874 = vst.msk [vmem:[%s1708_s26 + $0x48] sm:$0xff] %vm864_vm2, %v1448_v19 }
 0x29f   : > { %v1450_v20 = vpop.eup %1449 }
 0x2a0   : > { %873 = vst.msk [vmem:[%s1708_s26 + $0x40] sm:$0xff] %vm864_vm2, %v1450_v20 }
 0x2a1   : > { %s1805_s24 = smov (!%p884_p8, %s883_s24), 10 }
 0x2a2   : > { %s1177_s12 = sshll.u32 %s1805_s24, 7 }
 0x2a3   : > { %p1180_p9 = scmp.eq.s32.totalorder %s1177_s12, 0 }
 0x2a4   : > { %1451 = sdivrem.u32 (!%p1180_p9), %s1805_s24, 10 }
 0x2a5   : > { %892 = sbr.rel (%p1180_p9) target bundleno = 726 (0x2d6), region = 56 }
 0x2ad   : > { %s1743_s9 = spop.drf %1451 }
 0x2ae   : > { %p1181_p10 = scmp.le.s32.totalorder %s1743_s9, 0 }
 0x2af   : > { %s1798_s27 = smov (!%p1181_p10), %s1737_s11  ;;  %s1799_s14 = smov (!%p1181_p10), %s1708_s26 }
 0x2b0   : > { %1085 = sbr.rel (%p1181_p10) target bundleno = 701 (0x2bd), region = 132  ;;  %s1752_s13 = smov (!%p1181_p10), 0  }
 0x2b1   : > { %s1754_s15 = smov (!%p1181_p10), 0  }
 0x2b5 LB: >> { %v975_v21 = vld [vmem:[%s1517_s14] sm:$0xff]  ;;  %v977_v22 = vld [vmem:[%s1517_s14 + $0x8] sm:$0xff]  ;;  %v979_v23 = vld [vmem:[%s1517_s14 + $0x10] sm:$0xff]  ;;  %s995_s16 = sadd.s32 1, %s1521_s13  ;;  %s969_s15 = sadd.s32 1, %s1525_s15   ;;  %s1525_s15 = sphi %s1754_s15, %s969_s15   ;;  %s1521_s13 = sphi %s1752_s13, %s1800_s13   ;;  %s1517_s14 = sphi %s1799_s14, %s1000_s14   ;;  %s1513_s27 = sphi %s1798_s27, %s1001_s27  }
 0x2b6   : >> { %976 = vst [vmem:[%s1513_s27] sm:$0xff] %v975_v21  ;;  %978 = vst [vmem:[%s1513_s27 + $0x8] sm:$0xff] %v977_v22  ;;  %v981_v24 = vld [vmem:[%s1517_s14 + $0x18] sm:$0xff]  ;;  %v983_v25 = vld [vmem:[%s1517_s14 + $0x20] sm:$0xff]  ;;  %p996_p11 = scmp.ge.s32.totalorder %s995_s16, %s1743_s9  ;;  %p968_p12 = scmp.ge.s32.totalorder %s969_s15, %s1743_s9 }
 0x2b7   : >> { %980 = vst [vmem:[%s1513_s27 + $0x10] sm:$0xff] %v979_v23  ;;  %v985_v26 = vld [vmem:[%s1517_s14 + $0x28] sm:$0xff]  ;;  %982 = vst [vmem:[%s1513_s27 + $0x18] sm:$0xff] %v981_v24  ;;  %v987_v27 = vld [vmem:[%s1517_s14 + $0x30] sm:$0xff] }
 0x2b8   : >> { %984 = vst [vmem:[%s1513_s27 + $0x20] sm:$0xff] %v983_v25  ;;  %986 = vst [vmem:[%s1513_s27 + $0x28] sm:$0xff] %v985_v26  ;;  %v989_v28 = vld [vmem:[%s1517_s14 + $0x38] sm:$0xff]  ;;  %v991_v29 = vld [vmem:[%s1517_s14 + $0x40] sm:$0xff]  ;;  %s1807_s16 = smov (%p996_p11, %s995_s16), 0  ;;  %971 = sbr.rel (!%p968_p12) target bundleno = 693 (0x2b5), region = 138 }
 0x2b9   : >> { %988 = vst [vmem:[%s1513_s27 + $0x30] sm:$0xff] %v987_v27  ;;  %990 = vst [vmem:[%s1513_s27 + $0x38] sm:$0xff] %v989_v28  ;;  %v993_v30 = vld [vmem:[%s1517_s14 + $0x48] sm:$0xff]  ;;  %s998_s17 = smul.u32 80, %s1807_s16  ;;  %s1800_s13 = smov %s1807_s16 }
 0x2ba   : >> { %992 = vst [vmem:[%s1513_s27 + $0x40] sm:$0xff] %v991_v29  ;;  %994 = vst [vmem:[%s1513_s27 + $0x48] sm:$0xff] %v993_v30 }
 0x2bb   : >> { %s1000_s14 = scalar_lea.vmem %s1708_s26, %s998_s17 [#allocation2]   ;;  %s1001_s27 = scalar_lea.vmem %s1737_s11, %s998_s17  }
 0x2bd PF: > { %1453 = sdivrem.u32 %s1805_s24, 10 }
 0x2be   : > { %s1182_s18 = smul.u32 80, %s1743_s9 }
 0x2c0   : > { %s1006_s19 = scalar_lea.vmem %s1708_s26, %s1182_s18 [#allocation2]   ;;  %s1008_s20 = scalar_lea.vmem %s1737_s11, %s1182_s18  }
 0x2c6   : > { %s1454_s21 = spop.drf %1453 }
 0x2c7   : > { %p1184_p13 = scmp.le.s32.totalorder %s1454_s21, 0 }
 0x2c8   : > { %s1527_s22 = smov (!%p1184_p13), %s1008_s20   ;;  %s1531_s23 = smov (!%p1184_p13), %s1006_s19  }
 0x2c9   : > { %1099 = sbr.rel (%p1184_p13) target bundleno = 726 (0x2d6), region = 143  ;;  %s1535_s29 = smov (!%p1184_p13), 0  }
 0x2ca   : > { %s1539_s30 = smov (!%p1184_p13), 0  }
 0x2ce LB: >> { %v1018_v31 = vld [vmem:[%s1533_s23] sm:$0xff]  ;;  %s1020_s10 = sadd.s32 1, %s1537_s29  ;;  %s1012_s30 = sadd.s32 1, %s1541_s30   ;;  %s1541_s30 = sphi %s1539_s30, %s1012_s30   ;;  %s1537_s29 = sphi %s1535_s29, %s1536_s29   ;;  %s1533_s23 = sphi %s1531_s23, %s1025_s23   ;;  %s1529_s22 = sphi %s1527_s22, %s1026_s22  }
 0x2cf   : >> { %1019 = vst [vmem:[%s1529_s22] sm:$0xff] %v1018_v31  ;;  %p1021_p0 = scmp.ge.s32.totalorder %s1020_s10, %s1454_s21  ;;  %p1011_p1 = scmp.ge.s32.totalorder %s1012_s30, %s1454_s21 }
 0x2d1   : >> { %s1809_s10 = smov (%p1021_p0, %s1020_s10), 0  ;;  %1014 = sbr.rel (!%p1011_p1) target bundleno = 718 (0x2ce), region = 149 }
 0x2d2   : >> { %s1185_s26 = sshll.u32 %s1809_s10, 3  ;;  %s1536_s29 = smov %s1809_s10  }
 0x2d3   : >> { %s1025_s23 = scalar_lea.vmem %s1006_s19, %s1185_s26 [#allocation2]   ;;  %s1026_s22 = scalar_lea.vmem %s1008_s20, %s1185_s26  }
 0x2d6 PF: > { %p14_p2 = scmp.ge.s32.totalorder %s1598_s28, 6   ;;  %s1801_s24 = smov %s1505_s25 }
 0x2d7   : > { %s1802_s25 = smov %s1606_s8  ;;  %s1803_s26 = smov %s1598_s28 }
 0x2d8   :  { %16 = sbr.rel (!%p14_p2) target bundleno = 2 (0x2), region = 160 }

</bundles_post_ra>
